<compile_context>
chip_gen: v7x
topology: tpu7x:2x2x1
jax: 0.10.0
libtpu: 0.0.40
codegen_flags: <defaults>
</compile_context>

<pallas_src>
import jax
import jax.numpy as jnp
from jax.experimental import pallas as pl
from jax.experimental.pallas import tpu as pltpu

LANE = 128          # padded width of the final matmul (MXU-native lane count)
OUT_DIM = 4         # real number of policy logits
HIDDEN = 256
IN_DIM = 16


def _round_up(n, m):
    return -(-n // m) * m


def policy2048_kernel(x_ref, w1_ref, b1_ref, w2_ref, b2_ref, w3_ref, b3_ref, o_ref):
    # One [TB, 16] batch tile per grid step; weights are VMEM-resident across steps.
    x = x_ref[...].astype(jnp.bfloat16)                                      # [TB, 16]

    # Linear(16, 256) + ReLU  (bf16 MXU operands, f32 accumulation)
    h1 = jnp.dot(x, w1_ref[...], preferred_element_type=jnp.float32) + b1_ref[...]
    h1 = jnp.maximum(h1, 0.0).astype(jnp.bfloat16)                           # [TB, 256]

    # Linear(256, 256) + ReLU
    h2 = jnp.dot(h1, w2_ref[...], preferred_element_type=jnp.float32) + b2_ref[...]
    h2 = jnp.maximum(h2, 0.0).astype(jnp.bfloat16)                           # [TB, 256]

    # Linear(256, 4), lane-padded to 128 outputs for the MXU (zero weights/bias on
    # pad lanes); only the 4 real logits are used below.
    logits = jnp.dot(h2, w3_ref[...], preferred_element_type=jnp.float32) + b3_ref[...]  # [TB, 128]
    lg = logits[:, :OUT_DIM]                                                 # [TB, 4]

    # Numerically stable softmax over the 4 real logits.
    m = jnp.max(lg, axis=-1, keepdims=True)
    e = jnp.exp(lg - m)
    s = jnp.sum(e, axis=-1, keepdims=True)
    # approx reciprocal on the otherwise-idle EUP; rows sum to 1 within ~1e-3.
    o_ref[...] = e * pl.reciprocal(s, approx=True)                           # [TB, 4]


def prepare_params(params):
    """Cast weights to bf16 and zero-pad the final layer to 128 output lanes."""
    w1 = params["w1"].astype(jnp.bfloat16)
    w2 = params["w2"].astype(jnp.bfloat16)
    b1 = params["b1"].astype(jnp.float32)
    b2 = params["b2"].astype(jnp.float32)
    w3 = jnp.zeros((HIDDEN, LANE), jnp.bfloat16).at[:, :OUT_DIM].set(
        params["w3"].astype(jnp.bfloat16))
    b3 = jnp.zeros((1, LANE), jnp.float32).at[:, :OUT_DIM].set(
        params["b3"].astype(jnp.float32))
    return w1, b1, w2, b2, w3, b3


def policy2048_forward(x, params, *, block_b=2048):
    """x: [B, 16] float32. params: dict of (W.T [in,out], b [1,out]) f32 arrays."""
    B = x.shape[0]
    w1, b1, w2, b2, w3, b3 = prepare_params(params)

    # Batch tile: multiple of 8 (f32 sublanes), capped at block_b.  For small/medium
    # batches size it ~B/2 so the grid has >=2 steps and both v7x TensorCores get work.
    if B <= 2 * block_b:
        tb = max(8, _round_up(-(-B // 2), 8))
    else:
        tb = block_b
    tb = min(tb, block_b)
    grid = pl.cdiv(B, tb)   # ragged last block OK: OOB rows are never written back

    const = lambda shape: pl.BlockSpec(shape, lambda i: (0, 0))
    out = pl.pallas_call(
        policy2048_kernel,
        out_shape=jax.ShapeDtypeStruct((B, OUT_DIM), jnp.float32),
        grid=(grid,),
        in_specs=[
            pl.BlockSpec((tb, IN_DIM), lambda i: (i, 0)),   # batch-tiled input
            const((IN_DIM, HIDDEN)),  const((1, HIDDEN)),   # resident weights/biases
            const((HIDDEN, HIDDEN)),  const((1, HIDDEN)),
            const((HIDDEN, LANE)),    const((1, LANE)),
        ],
        out_specs=pl.BlockSpec((tb, OUT_DIM), lambda i: (i, 0)),
        compiler_params=pltpu.CompilerParams(
            dimension_semantics=("parallel",),
            vmem_limit_bytes=48 * 1024 * 1024,   # headroom for 2K-row tiles on v5e's 16 MiB default
        ),
    )(x, w1, b1, w2, b2, w3, b3)
    return out


def init_params(key):
    """Deterministic init matching the nn.Linear shapes (weights stored as [in, out])."""
    k1, k2, k3, k4, k5, k6 = jax.random.split(key, 6)

    def linear(kw, kb, fan_in, fan_out):
        bound = 1.0 / jnp.sqrt(fan_in)
        w = jax.random.uniform(kw, (fan_in, fan_out), jnp.float32, -bound, bound)
        b = jax.random.uniform(kb, (1, fan_out), jnp.float32, -bound, bound)
        return w, b

    w1, b1 = linear(k1, k2, IN_DIM, HIDDEN)
    w2, b2 = linear(k3, k4, HIDDEN, HIDDEN)
    w3, b3 = linear(k5, k6, HIDDEN, OUT_DIM)
    return {"w1": w1, "b1": b1, "w2": w2, "b2": b2, "w3": w3, "b3": b3}


def reference_forward(x, p):
    h1 = jnp.maximum(x @ p["w1"] + p["b1"], 0.0)
    h2 = jnp.maximum(h1 @ p["w2"] + p["b2"], 0.0)
    logits = h2 @ p["w3"] + p["b3"]
    return jax.nn.softmax(logits, axis=-1)


if __name__ == "__main__":
    key = jax.random.PRNGKey(0)
    kx, kx2, kp = jax.random.split(key, 3)
    params = init_params(kp)

    # Small-batch check (single tile).
    B = 8
    x = jax.random.uniform(kx, (B, IN_DIM), jnp.float32, 0.0, 11.0)  # board encodings
    out = jax.block_until_ready(policy2048_forward(x, params))
    ref = reference_forward(x, params)
    assert out.shape == (B, OUT_DIM)
    assert jnp.allclose(jnp.sum(out, axis=-1), 1.0, atol=5e-3)
    # bf16 MXU operands + approx reciprocal -> relaxed tolerance vs f32 reference.
    assert jnp.allclose(out, ref, atol=2e-2)

    # Larger, non-multiple batch: exercises the 2-step grid and the ragged last block.
    B2 = 1030
    x2 = jax.random.uniform(kx2, (B2, IN_DIM), jnp.float32, 0.0, 11.0)
    out2 = jax.block_until_ready(policy2048_forward(x2, params))
    ref2 = reference_forward(x2, params)
    assert out2.shape == (B2, OUT_DIM)
    assert jnp.allclose(jnp.sum(out2, axis=-1), 1.0, atol=5e-3)
    assert jnp.allclose(out2, ref2, atol=3e-2)

    print("KERNEL_OK")
</pallas_src>

<mosaic_0001>
module attributes {stable_mosaic.version = 11 : i64} {
  func.func @policy2048_kernel(%arg0: i32, %arg1: memref<8x16xf32, #tpu.memory_space<vmem>>, %arg2: memref<16x256xbf16, #tpu.memory_space<vmem>>, %arg3: memref<1x256xf32, #tpu.memory_space<vmem>>, %arg4: memref<256x256xbf16, #tpu.memory_space<vmem>>, %arg5: memref<1x256xf32, #tpu.memory_space<vmem>>, %arg6: memref<256x128xbf16, #tpu.memory_space<vmem>>, %arg7: memref<1x128xf32, #tpu.memory_space<vmem>>, %arg8: memref<8x4xf32, #tpu.memory_space<vmem>>) attributes {dimension_semantics = [#tpu.dimension_semantics<parallel>], iteration_bounds = array<i64: 1>, scalar_prefetch = 0 : i64, scratch_operands = 0 : i64, tpu.core_type = #tpu.core_type<tc>, window_params = [{transform_indices = @transform_0, window_bounds = array<i64: 8, 16>}, {pipeline_mode = #tpu.pipeline_mode<synchronous>, transform_indices = @transform_1, window_bounds = array<i64: 16, 256>}, {pipeline_mode = #tpu.pipeline_mode<synchronous>, transform_indices = @transform_2, window_bounds = array<i64: 1, 256>}, {pipeline_mode = #tpu.pipeline_mode<synchronous>, transform_indices = @transform_3, window_bounds = array<i64: 256, 256>}, {pipeline_mode = #tpu.pipeline_mode<synchronous>, transform_indices = @transform_4, window_bounds = array<i64: 1, 256>}, {pipeline_mode = #tpu.pipeline_mode<synchronous>, transform_indices = @transform_5, window_bounds = array<i64: 256, 128>}, {pipeline_mode = #tpu.pipeline_mode<synchronous>, transform_indices = @transform_6, window_bounds = array<i64: 1, 128>}, {transform_indices = @transform_7, window_bounds = array<i64: 8, 4>}]} {
    %c0 = arith.constant 0 : index
    %c0_0 = arith.constant 0 : index
    %0 = vector.load %arg1[%c0, %c0_0] : memref<8x16xf32, #tpu.memory_space<vmem>>, vector<8x16xf32>
    %1 = arith.truncf %0 : vector<8x16xf32> to vector<8x16xbf16>
    %c0_1 = arith.constant 0 : index
    %c0_2 = arith.constant 0 : index
    %2 = vector.load %arg2[%c0_1, %c0_2] : memref<16x256xbf16, #tpu.memory_space<vmem>>, vector<16x256xbf16>
    %cst = arith.constant dense<0.000000e+00> : vector<8x256xf32>
    %3 = tpu.matmul %1, %2, %cst {dimension_numbers = #tpu.dot_dimension_numbers<[1], [0], [0], [1], [0, 0, 1, 1], [], []>} : vector<8x16xbf16>, vector<16x256xbf16>, vector<8x256xf32> -> vector<8x256xf32>
    %c0_3 = arith.constant 0 : index
    %c0_4 = arith.constant 0 : index
    %4 = vector.load %arg3[%c0_3, %c0_4] : memref<1x256xf32, #tpu.memory_space<vmem>>, vector<1x256xf32>
    %5 = vector.broadcast %4 : vector<1x256xf32> to vector<8x256xf32>
    %6 = arith.addf %3, %5 : vector<8x256xf32>
    %cst_5 = arith.constant 0.000000e+00 : f32
    %7 = vector.broadcast %cst_5 : f32 to vector<8x256xf32>
    %8 = arith.maximumf %6, %7 : vector<8x256xf32>
    %9 = arith.truncf %8 : vector<8x256xf32> to vector<8x256xbf16>
    %c0_6 = arith.constant 0 : index
    %c0_7 = arith.constant 0 : index
    %10 = vector.load %arg4[%c0_6, %c0_7] : memref<256x256xbf16, #tpu.memory_space<vmem>>, vector<256x256xbf16>
    %cst_8 = arith.constant dense<0.000000e+00> : vector<8x256xf32>
    %11 = tpu.matmul %9, %10, %cst_8 {dimension_numbers = #tpu.dot_dimension_numbers<[1], [0], [0], [1], [0, 0, 1, 1], [], []>} : vector<8x256xbf16>, vector<256x256xbf16>, vector<8x256xf32> -> vector<8x256xf32>
    %c0_9 = arith.constant 0 : index
    %c0_10 = arith.constant 0 : index
    %12 = vector.load %arg5[%c0_9, %c0_10] : memref<1x256xf32, #tpu.memory_space<vmem>>, vector<1x256xf32>
    %13 = vector.broadcast %12 : vector<1x256xf32> to vector<8x256xf32>
    %14 = arith.addf %11, %13 : vector<8x256xf32>
    %cst_11 = arith.constant 0.000000e+00 : f32
    %15 = vector.broadcast %cst_11 : f32 to vector<8x256xf32>
    %16 = arith.maximumf %14, %15 : vector<8x256xf32>
    %17 = arith.truncf %16 : vector<8x256xf32> to vector<8x256xbf16>
    %c0_12 = arith.constant 0 : index
    %c0_13 = arith.constant 0 : index
    %18 = vector.load %arg6[%c0_12, %c0_13] : memref<256x128xbf16, #tpu.memory_space<vmem>>, vector<256x128xbf16>
    %cst_14 = arith.constant dense<0.000000e+00> : vector<8x128xf32>
    %19 = tpu.matmul %17, %18, %cst_14 {dimension_numbers = #tpu.dot_dimension_numbers<[1], [0], [0], [1], [0, 0, 1, 1], [], []>} : vector<8x256xbf16>, vector<256x128xbf16>, vector<8x128xf32> -> vector<8x128xf32>
    %c0_15 = arith.constant 0 : index
    %c0_16 = arith.constant 0 : index
    %20 = vector.load %arg7[%c0_15, %c0_16] : memref<1x128xf32, #tpu.memory_space<vmem>>, vector<1x128xf32>
    %21 = vector.broadcast %20 : vector<1x128xf32> to vector<8x128xf32>
    %22 = arith.addf %19, %21 : vector<8x128xf32>
    %23 = vector.extract_strided_slice %22 {offsets = [0, 0], sizes = [8, 4], strides = [1, 1]} : vector<8x128xf32> to vector<8x4xf32>
    %cst_17 = arith.constant dense<0xFF800000> : vector<8xf32>
    %24 = vector.multi_reduction <maximumf>, %23, %cst_17 [1] : vector<8x4xf32> to vector<8xf32>
    %25 = vector.shape_cast %24 : vector<8xf32> to vector<8x1xf32>
    %26 = vector.broadcast %25 : vector<8x1xf32> to vector<8x4xf32>
    %27 = arith.subf %23, %26 : vector<8x4xf32>
    %28 = math.exp %27 : vector<8x4xf32>
    %cst_18 = arith.constant dense<0.000000e+00> : vector<8xf32>
    %29 = vector.multi_reduction <add>, %28, %cst_18 [1] : vector<8x4xf32> to vector<8xf32>
    %30 = vector.shape_cast %29 : vector<8xf32> to vector<8x1xf32>
    %31 = tpu.reciprocal %30 {approx = true} : vector<8x1xf32> -> vector<8x1xf32>
    %32 = vector.broadcast %31 : vector<8x1xf32> to vector<8x4xf32>
    %33 = arith.mulf %28, %32 : vector<8x4xf32>
    %c0_19 = arith.constant 0 : index
    %c0_20 = arith.constant 0 : index
    %34 = vector.load %arg8[%c0_19, %c0_20] : memref<8x4xf32, #tpu.memory_space<vmem>>, vector<8x4xf32>
    tpu.vector_store %arg8[%c0_19, %c0_20], %33 {strides = array<i32>} : memref<8x4xf32, #tpu.memory_space<vmem>>, vector<8x4xf32>,
    return
  }
  func.func @transform_0(%arg0: i32) -> (i32, i32) {
    %c0_i32 = arith.constant 0 : i32
    %c0_i32_0 = arith.constant 0 : i32
    return %arg0, %c0_i32 : i32, i32
  }
  func.func @transform_1(%arg0: i32) -> (i32, i32) {
    %c0_i32 = arith.constant 0 : i32
    %c0_i32_0 = arith.constant 0 : i32
    %c0_i32_1 = arith.constant 0 : i32
    return %c0_i32, %c0_i32_0 : i32, i32
  }
  func.func @transform_2(%arg0: i32) -> (i32, i32) {
    %c0_i32 = arith.constant 0 : i32
    %c0_i32_0 = arith.constant 0 : i32
    %c0_i32_1 = arith.constant 0 : i32
    return %c0_i32, %c0_i32_0 : i32, i32
  }
  func.func @transform_3(%arg0: i32) -> (i32, i32) {
    %c0_i32 = arith.constant 0 : i32
    %c0_i32_0 = arith.constant 0 : i32
    %c0_i32_1 = arith.constant 0 : i32
    return %c0_i32, %c0_i32_0 : i32, i32
  }
  func.func @transform_4(%arg0: i32) -> (i32, i32) {
    %c0_i32 = arith.constant 0 : i32
    %c0_i32_0 = arith.constant 0 : i32
    %c0_i32_1 = arith.constant 0 : i32
    return %c0_i32, %c0_i32_0 : i32, i32
  }
  func.func @transform_5(%arg0: i32) -> (i32, i32) {
    %c0_i32 = arith.constant 0 : i32
    %c0_i32_0 = arith.constant 0 : i32
    %c0_i32_1 = arith.constant 0 : i32
    return %c0_i32, %c0_i32_0 : i32, i32
  }
  func.func @transform_6(%arg0: i32) -> (i32, i32) {
    %c0_i32 = arith.constant 0 : i32
    %c0_i32_0 = arith.constant 0 : i32
    %c0_i32_1 = arith.constant 0 : i32
    return %c0_i32, %c0_i32_0 : i32, i32
  }
  func.func @transform_7(%arg0: i32) -> (i32, i32) {
    %c0_i32 = arith.constant 0 : i32
    %c0_i32_0 = arith.constant 0 : i32
    return %arg0, %c0_i32 : i32, i32
  }
}

</mosaic_0001>

<bundles_post_ra>
// kernel: tpu_custom_call.1
= control target key start
LH: loop header
LB: loop body
LE: loop exit
PB: predicated region body
PF: predicated region fallthrough
CT: control target
= control target key end

     0   :  { %12 = vsyncpa [#allocation3], 0  ;;  %s962_s0 = inlined_call_operand.hbm [shape: f32[8,16], index: 0, kind: input, shape index: {}]   ;;  %s963_s1 = inlined_call_operand.hbm [shape: bf16[16,256], index: 1, kind: input, shape index: {}]   ;;  %s964_s2 = inlined_call_operand.vmem [shape: f32[1,256], index: 2, kind: input, shape index: {}]   ;;  %s965_s3 = inlined_call_operand.hbm [shape: bf16[256,256], index: 3, kind: input, shape index: {}]   ;;  %s966_s4 = inlined_call_operand.vmem [shape: f32[1,256], index: 4, kind: input, shape index: {}]   ;;  %s967_s5 = inlined_call_operand.hbm [shape: bf16[256,128], index: 5, kind: input, shape index: {}]   ;;  %s968_s6 = inlined_call_operand.vmem [shape: f32[1,128], index: 6, kind: input, shape index: {}]   ;;  %s969_s7 = inlined_call_operand.vmem [shape: f32[8,4], index: 7, kind: output, shape index: {}]  }
   0x1   :  { %13 = vsyncpa [#allocation5], 0 }
   0x2   :  { %14 = vsyncpa [#allocation8], 0  ;;  %s847_s24 = smov [#allocation4]   ;;  %s753_s28 = scalar_lea.hbm %s963_s1, 256 }
   0x3   :  { %s30_s25 = sshll.u32 %s847_s24, 4  ;;  %p754_p0 = scmp.ne.s32.totalorder %s963_s1, %s753_s28  ;;  %s31_s25 = int_to_ptr.vmem [resolvable:$true] %s30_s25 }
   0x4   :  { %p757_p1 = scmp.lt.u32.totalorder %s753_s28, %s963_s1 }
   0x6   :  { %p759_p2 = pnand %p757_p1, %p754_p0 }
   0x8   :  { %762 = shalt.err (!%p759_p2)
}
   0x9   :  { %s763_s10 = scalar_lea.vmem %s31_s25, 256  ;;  %p768_p4 = scmp.lt.s32.totalorder %s31_s25, %s31_s25 }
   0xa   :  { %p764_p3 = scmp.ne.s32.totalorder %s31_s25, %s763_s10  ;;  %p769_p5 = scmp.lt.s32.totalorder %s763_s10, %s763_s10 }
   0xc   :  { %p770_p6 = por %p769_p5, %p768_p4 }
   0xe   :  { %p771_p7 = pnand %p770_p6, %p764_p3 }
  0x10   :  { %774 = shalt.err (!%p771_p7)
}
  0x11   :  { %s848_s11 = smov 128   ;;  %s849_s12 = smov 8  }
  0x12   :  { %36 = dma.hbm_to_vmem [thread:$0]  %s963_s1, 256, %s31_s25, [#allocation5], %s848_s11, %s848_s11, %s849_s12  }
  0x13   :  { %s850_s15 = smov [#allocation2]   ;;  %s851_s17 = smov [#allocation6]  }
  0x14   :  { %s21_s16 = sshll.u32 %s850_s15, 4  ;;  %s44_s18 = sshll.u32 %s851_s17, 4  ;;  %s22_s16 = int_to_ptr.vmem [resolvable:$true] %s21_s16  ;;  %s45_s18 = int_to_ptr.vmem [resolvable:$true] %s44_s18 }
  0x15   :  { %s775_s21 = scalar_lea.hbm %s962_s0, 128 }
  0x16   :  { %p776_p8 = scmp.ne.s32.totalorder %s962_s0, %s775_s21  ;;  %p779_p9 = scmp.lt.u32.totalorder %s775_s21, %s962_s0 }
  0x18   :  { %p781_p10 = pnand %p779_p9, %p776_p8 }
  0x1a   :  { %784 = shalt.err (!%p781_p10)
}
  0x1b   :  { %s785_s1 = scalar_lea.vmem %s22_s16, 128  ;;  %p790_p12 = scmp.lt.s32.totalorder %s22_s16, %s22_s16 }
  0x1c   :  { %p786_p11 = scmp.ne.s32.totalorder %s22_s16, %s785_s1  ;;  %p791_p13 = scmp.lt.s32.totalorder %s785_s1, %s785_s1 }
  0x1e   :  { %p792_p0 = por %p791_p13, %p790_p12 }
  0x20   :  { %p793_p1 = pnand %p792_p0, %p786_p11 }
  0x22   :  { %796 = shalt.err (!%p793_p1)
}
  0x23   :  { %24 = dma.hbm_to_vmem [thread:$0]  %s962_s0, 128, %s22_s16, [#allocation3]  }
  0x24   :  { %s797_s30 = scalar_lea.hbm %s965_s3, 4096 }
  0x25   :  { %p798_p2 = scmp.ne.s32.totalorder %s965_s3, %s797_s30  ;;  %p801_p3 = scmp.lt.u32.totalorder %s797_s30, %s965_s3 }
  0x27   :  { %p803_p4 = pnand %p801_p3, %p798_p2 }
  0x29   :  { %806 = shalt.err (!%p803_p4)
}
  0x2a   :  { %s807_s14 = scalar_lea.vmem %s45_s18, 4096  ;;  %p812_p6 = scmp.lt.s32.totalorder %s45_s18, %s45_s18 }
  0x2b   :  { %p808_p5 = scmp.ne.s32.totalorder %s45_s18, %s807_s14  ;;  %p813_p7 = scmp.lt.s32.totalorder %s807_s14, %s807_s14 }
  0x2d   :  { %p814_p8 = por %p813_p7, %p812_p6 }
  0x2f   :  { %p815_p9 = pnand %p814_p8, %p808_p5 }
  0x31   :  { %818 = shalt.err (!%p815_p9)
}
  0x32   :  { %50 = dma.hbm_to_vmem [thread:$0]  %s965_s3, 4096, %s45_s18, [#allocation5], %s848_s11, %s848_s11, %s849_s12  }
  0x33   :  { %s852_s16 = smov [#allocation7]   ;;  %s819_s21 = scalar_lea.hbm %s967_s5, 2048 }
  0x34   :  { %s58_s17 = sshll.u32 %s852_s16, 4  ;;  %p820_p10 = scmp.ne.s32.totalorder %s967_s5, %s819_s21  ;;  %s59_s17 = int_to_ptr.vmem [resolvable:$true] %s58_s17 }
  0x35   :  { %p823_p11 = scmp.lt.u32.totalorder %s819_s21, %s967_s5 }
  0x37   :  { %p825_p12 = pnand %p823_p11, %p820_p10 }
  0x39   :  { %828 = shalt.err (!%p825_p12)
}
  0x3a   :  { %s829_s1 = scalar_lea.vmem %s59_s17, 2048  ;;  %p834_p0 = scmp.lt.s32.totalorder %s59_s17, %s59_s17 }
  0x3b   :  { %p830_p13 = scmp.ne.s32.totalorder %s59_s17, %s829_s1  ;;  %p835_p1 = scmp.lt.s32.totalorder %s829_s1, %s829_s1 }
  0x3d   :  { %p836_p2 = por %p835_p1, %p834_p0 }
  0x3f   :  { %p837_p3 = pnand %p836_p2, %p830_p13 }
  0x41   :  { %840 = shalt.err (!%p837_p3)
}
  0x42   :  { %s853_s3 = smov 64   ;;  %s854_s11 = smov 4  }
  0x43   :  { %64 = dma.hbm_to_vmem [thread:$0]  %s967_s5, 2048, %s59_s17, [#allocation8], %s853_s3, %s853_s3, %s854_s11  }
  0x44   :  { %841 = dma.done.wait [#allocation3], 128  }
  0x45   :  { %842 = vsyncadd [#allocation3], 4294967168 }
  0x46   :  { %843 = dma.done.wait [#allocation5], 4352  }
  0x47   :  { %844 = vsyncadd [#allocation5], 4294962944 }
  0x48   :  { %845 = dma.done.wait [#allocation8], 2048  }
  0x49   :  { %846 = vsyncadd [#allocation8], 4294965248  ;;  %v855_v0 = vmov 0   ;;  %v682_v1 = vld [vmem:[#allocation4 + $0x4] ss:$8 sps:$4 sm:$0xff]   ;;  %v80_v3 = vld [vmem:[#allocation2] sm:$0xff]  ;;  %v86_v49 = vlaneseq }
  0x4a   :  { %142 = vmatprep.mubr.bf16.mxu0 %v855_v0  ;;  %v684_v2 = vld [vmem:[#allocation4] ss:$8 sps:$4 sm:$0xff]   ;;  %110 = vmatprep.subr.bf16.mxu0 %v682_v1  ;;  %v81_v4 = vpack.c.bf16 %v80_v3, %v80_v3  ;;  %v685_v5 = vld [vmem:[#allocation6 + $0x4] ss:$8 sps:$4 sm:$0xff]   ;;  %v687_v6 = vld [vmem:[#allocation6] ss:$8 sps:$4 sm:$0xff]  }
  0x4b   :  { %111 = vmatpush1.bf16.msra.mxu0 %v684_v2  ;;  %vm106_vm0 = vcmask 130048   ;;  %v688_v7 = vld [vmem:[#allocation6 + $0x14] ss:$8 sps:$4 sm:$0xff]   ;;  %359 = vmatprep.subr.bf16.mxu1 %v685_v5  ;;  %v690_v8 = vld [vmem:[#allocation6 + $0x10] ss:$8 sps:$4 sm:$0xff]   ;;  %v733_v37 = vld [vmem:[#allocation7 + $0x40] sm:$0xff]  }
  0x4c   :  { %360 = vmatpush1.bf16.msra.mxu1 %v687_v6  ;;  %v691_v9 = vld [vmem:[#allocation6 + $0x24] ss:$8 sps:$4 sm:$0xff]   ;;  %v693_v10 = vld [vmem:[#allocation6 + $0x20] ss:$8 sps:$4 sm:$0xff]   ;;  %v694_v11 = vld [vmem:[#allocation6 + $0x34] ss:$8 sps:$4 sm:$0xff]   ;;  %651 = vmatprep.subr.bf16.mxu0 %v733_v37 }
  0x4d   :  { %361 = vmatprep.subr.bf16.mxu1 %v688_v7  ;;  %v696_v12 = vld [vmem:[#allocation6 + $0x30] ss:$8 sps:$4 sm:$0xff]   ;;  %v697_v13 = vld [vmem:[#allocation6 + $0x44] ss:$8 sps:$4 sm:$0xff]   ;;  %v699_v14 = vld [vmem:[#allocation6 + $0x40] ss:$8 sps:$4 sm:$0xff]  }
  0x4e   :  { %601 = vmatmul.mubr.msk.bf16.vlgmr.msra.gmra.mrb[0].mxu0 %vm106_vm0, %v81_v4  ;;  %v700_v15 = vld [vmem:[#allocation6 + $0x54] ss:$8 sps:$4 sm:$0xff]   ;;  %v702_v16 = vld [vmem:[#allocation6 + $0x50] ss:$8 sps:$4 sm:$0xff]   ;;  %v703_v17 = vld [vmem:[#allocation6 + $0x64] ss:$8 sps:$4 sm:$0xff]  }
  0x4f   :  { %v705_v18 = vld [vmem:[#allocation6 + $0x60] ss:$8 sps:$4 sm:$0xff]   ;;  %v706_v19 = vld [vmem:[#allocation6 + $0x74] ss:$8 sps:$4 sm:$0xff]   ;;  %v708_v20 = vld [vmem:[#allocation6 + $0x70] ss:$8 sps:$4 sm:$0xff]  }
  0x50   :  { %362 = vmatpush1.bf16.msra.mxu1 %v690_v8  ;;  %v709_v21 = vld [vmem:[#allocation6 + $0x84] ss:$8 sps:$4 sm:$0xff]   ;;  %v711_v22 = vld [vmem:[#allocation6 + $0x80] ss:$8 sps:$4 sm:$0xff]   ;;  %v712_v23 = vld [vmem:[#allocation6 + $0x94] ss:$8 sps:$4 sm:$0xff]  }
  0x51   :  { %363 = vmatprep.subr.bf16.mxu1 %v691_v9  ;;  %v714_v24 = vld [vmem:[#allocation6 + $0x90] ss:$8 sps:$4 sm:$0xff]   ;;  %v715_v25 = vld [vmem:[#allocation6 + $0xa4] ss:$8 sps:$4 sm:$0xff]   ;;  %v717_v26 = vld [vmem:[#allocation6 + $0xa0] ss:$8 sps:$4 sm:$0xff]  }
  0x52   :  { %v718_v27 = vld [vmem:[#allocation6 + $0xb4] ss:$8 sps:$4 sm:$0xff]   ;;  %v720_v28 = vld [vmem:[#allocation6 + $0xb0] ss:$8 sps:$4 sm:$0xff]   ;;  %v721_v29 = vld [vmem:[#allocation6 + $0xc4] ss:$8 sps:$4 sm:$0xff]  }
  0x53   :  { %v723_v30 = vld [vmem:[#allocation6 + $0xc0] ss:$8 sps:$4 sm:$0xff]   ;;  %v724_v31 = vld [vmem:[#allocation6 + $0xd4] ss:$8 sps:$4 sm:$0xff]   ;;  %v726_v32 = vld [vmem:[#allocation6 + $0xd0] ss:$8 sps:$4 sm:$0xff]  }
  0x54   :  { %364 = vmatpush1.bf16.msra.mxu1 %v693_v10  ;;  %v727_v33 = vld [vmem:[#allocation6 + $0xe4] ss:$8 sps:$4 sm:$0xff]   ;;  %v729_v34 = vld [vmem:[#allocation6 + $0xe0] ss:$8 sps:$4 sm:$0xff]   ;;  %v730_v35 = vld [vmem:[#allocation6 + $0xf4] ss:$8 sps:$4 sm:$0xff]  }
  0x55   :  { %365 = vmatprep.subr.bf16.mxu1 %v694_v11  ;;  %v732_v36 = vld [vmem:[#allocation6 + $0xf0] ss:$8 sps:$4 sm:$0xff]   ;;  %v734_v38 = vld [vmem:[#allocation7] sm:$0xff]   ;;  %v735_v39 = vld [vmem:[#allocation7 + $0x48] sm:$0xff]   ;;  %v87_v50 = vshrl.u32 %v86_v49, 7  ;;  %vm579_vm1 = vcmask 31744  }
  0x56   :  { %652 = vmatpush3.bf16.msra.mxu0 %v734_v38  ;;  %v736_v40 = vld [vmem:[#allocation7 + $0x8] sm:$0xff]   ;;  %v737_v41 = vld [vmem:[#allocation7 + $0x50] sm:$0xff]   ;;  %v739_v43 = vld [vmem:[#allocation7 + $0x58] sm:$0xff]  }
  0x57   :  { %653 = vmatprep.subr.bf16.mxu0 %v735_v39  ;;  %v738_v42 = vld [vmem:[#allocation7 + $0x10] sm:$0xff]   ;;  %v740_v44 = vld [vmem:[#allocation7 + $0x18] sm:$0xff]   ;;  %v741_v45 = vld [vmem:[#allocation7 + $0x60] sm:$0xff]   ;;  %v88_v51 = vsub.s32 0, %v87_v50  ;;  %v92_v53 = vsub.s32 1, %v87_v50 }
  0x58   :  { %366 = vmatpush1.bf16.msra.mxu1 %v696_v12  ;;  %v742_v46 = vld [vmem:[#allocation7 + $0x20] sm:$0xff]   ;;  %v743_v47 = vld [vmem:[#allocation7 + $0x68] sm:$0xff]   ;;  %v745_v2 = vld [vmem:[#allocation7 + $0x70] sm:$0xff]  }
  0x59   :  { %367 = vmatprep.subr.bf16.mxu1 %v697_v13  ;;  %v744_v48 = vld [vmem:[#allocation7 + $0x28] sm:$0xff]   ;;  %v746_v3 = vld [vmem:[#allocation7 + $0x30] sm:$0xff]   ;;  %v747_v4 = vld [vmem:[#allocation7 + $0x78] sm:$0xff]  }
  0x5a   :  { %654 = vmatpush3.bf16.msra.mxu0 %v736_v40  ;;  %v84_v52 = vld [vmem:[%s964_s2] sm:$0x3]  ;;  %v748_v5 = vld [vmem:[#allocation7 + $0x38] sm:$0xff]  }
  0x5b   :  { %655 = vmatprep.subr.bf16.mxu0 %v737_v41  ;;  %v89_v54 = vrot.slane %v84_v52, %v88_v51  ;;  %v93_v55 = vrot.slane %v84_v52, %v92_v53  ;;  %v187_v6 = vld [vmem:[%s966_s4] sm:$0x3] }
  0x5c   :  { %368 = vmatpush1.bf16.msra.mxu1 %v699_v14  ;;  %v192_v7 = vrot.slane %v187_v6, %v88_v51  ;;  %v196_v8 = vrot.slane %v187_v6, %v92_v53 }
  0x5d   :  { %369 = vmatprep.subr.bf16.mxu1 %v700_v15 }
  0x5e   :  { %656 = vmatpush3.bf16.msra.mxu0 %v738_v42 }
  0x5f   :  { %657 = vmatprep.subr.bf16.mxu0 %v739_v43 }
  0x60   :  { %370 = vmatpush1.bf16.msra.mxu1 %v702_v16 }
  0x61   :  { %371 = vmatprep.subr.bf16.mxu1 %v703_v17 }
  0x62   :  { %658 = vmatpush3.bf16.msra.mxu0 %v740_v44 }
  0x63   :  { %659 = vmatprep.subr.bf16.mxu0 %v741_v45 }
  0x64   :  { %372 = vmatpush1.bf16.msra.mxu1 %v705_v18 }
  0x65   :  { %373 = vmatprep.subr.bf16.mxu1 %v706_v19 }
  0x66   :  { %660 = vmatpush3.bf16.msra.mxu0 %v742_v46 }
  0x67   :  { %661 = vmatprep.subr.bf16.mxu0 %v743_v47 }
  0x68   :  { %374 = vmatpush1.bf16.msra.mxu1 %v708_v20 }
  0x69   :  { %375 = vmatprep.subr.bf16.mxu1 %v709_v21  ;;  %v634_v21 = vld [vmem:[%s968_s6] ss:$0 sm:$0xff] }
  0x6a   :  { %662 = vmatpush3.bf16.msra.mxu0 %v744_v48 }
  0x6b   :  { %663 = vmatprep.subr.bf16.mxu0 %v745_v2 }
  0x6c   :  { %376 = vmatpush1.bf16.msra.mxu1 %v711_v22 }
  0x6d   :  { %377 = vmatprep.subr.bf16.mxu1 %v712_v23 }
  0x6e   :  { %664 = vmatpush3.bf16.msra.mxu0 %v746_v3 }
  0x6f   :  { %665 = vmatprep.subr.bf16.mxu0 %v747_v4 }
  0x70   :  { %378 = vmatpush1.bf16.msra.mxu1 %v714_v24 }
  0x71   :  { %379 = vmatprep.subr.bf16.mxu1 %v715_v25 }
  0x72   :  { %666 = vmatpush3.bf16.msra.mxu0 %v748_v5 }
  0x74   :  { %380 = vmatpush1.bf16.msra.mxu1 %v717_v26 }
  0x75   :  { %381 = vmatprep.subr.bf16.mxu1 %v718_v27 }
  0x78   :  { %382 = vmatpush1.bf16.msra.mxu1 %v720_v28 }
  0x79   :  { %383 = vmatprep.subr.bf16.mxu1 %v721_v29 }
  0x7c   :  { %384 = vmatpush1.bf16.msra.mxu1 %v723_v30 }
  0x7d   :  { %385 = vmatprep.subr.bf16.mxu1 %v724_v31 }
  0x80   :  { %386 = vmatpush1.bf16.msra.mxu1 %v726_v32 }
  0x81   :  { %387 = vmatprep.subr.bf16.mxu1 %v727_v33 }
  0x84   :  { %388 = vmatpush1.bf16.msra.mxu1 %v729_v34 }
  0x85   :  { %389 = vmatprep.subr.bf16.mxu1 %v730_v35 }
  0x88   :  { %390 = vmatpush1.bf16.msra.mxu1 %v732_v36 }
 0x121   :  { %v144_v56 = vpop.f32.mrb[0].mxu0 }
 0x122   :  { %v145_v57 = vadd.f32 %v144_v56, %v89_v54  ;;  %v146_v58 = vpop.f32.mrb[1].mxu0 }
 0x123   :  { %v147_v59 = vadd.f32 %v146_v58, %v93_v55  ;;  %v148_v60 = vpop.f32.mrb[2].mxu0 }
 0x124   :  { %v151_v61 = vmax.f32 %v145_v57, 0.0  ;;  %v149_v62 = vpop.f32.mrb[3].mxu0 }
 0x125   :  { %v152_v63 = vmax.f32 %v147_v59, 0.0 }
 0x126   :  { %v153_v1 = vpack.c.bf16 %v151_v61, %v151_v61 }
 0x127   :  { %v154_v0 = vpack.c.bf16 %v152_v63, %v152_v63 }
 0x129   :  { %391 = vmatprep.mubr.bf16.mxu1 %v154_v0 }
 0x12a   :  { %392 = vmatmul.mubr.bf16.vlgmr.msra.gmra.mrb[0].mxu1 %v153_v1 }
 0x1fd   :  { %v393_v9 = vpop.f32.mrb[0].mxu1 }
 0x1fe   :  { %v394_v10 = vadd.f32 %v393_v9, %v192_v7  ;;  %v395_v11 = vpop.f32.mrb[1].mxu1 }
 0x1ff   :  { %v396_v12 = vadd.f32 %v395_v11, %v196_v8  ;;  %v397_v13 = vpop.f32.mrb[2].mxu1 }
 0x200   :  { %v400_v14 = vmax.f32 %v394_v10, 0.0  ;;  %v398_v15 = vpop.f32.mrb[3].mxu1 }
 0x201   :  { %v401_v16 = vmax.f32 %v396_v12, 0.0 }
 0x202   :  { %v402_v18 = vpack.c.bf16 %v400_v14, %v400_v14 }
 0x203   :  { %v403_v17 = vpack.c.bf16 %v401_v16, %v401_v16 }
 0x205   :  { %571 = vmatprep.mubr.bf16.mxu0 %v403_v17 }
 0x206   :  { %572 = vmatmul.mubr.bf16.vlgmr.msra.gmra.mrb[4].mxu0 %v402_v18 }
 0x2d9   :  { %v667_v19 = vpop.f32.mrb[4].mxu0 }
 0x2da   :  { %v668_v20 = vpop.f32.mrb[5].mxu0 }
 0x2db   :  { %v669_v22 = vadd.f32 %v668_v20, %v667_v19  ;;  %v670_v23 = vpop.f32.mrb[6].mxu0 }
 0x2dc   :  { %v671_v24 = vpop.f32.mrb[7].mxu0 }
 0x2dd   :  { %v574_v25 = vadd.f32 %v669_v22, %v634_v21 }
 0x2df   :  { %v580_v26 = vsel %vm579_vm1, %v574_v25, -inf }
 0x2e0   :  { %581 = vmax.xlane.f32.xlu0 %v580_v26 }
 0x36d   :  { %v582_v27 = vpop.xlane.xlu0 %581 }
 0x36e   :  { %v583_v28 = vsub.f32 %v574_v25, %v582_v27 }
 0x370   :  { %v584_v29 = vmul.f32 1.442695, %v583_v28 }
 0x372   :  { %749 = vpow2.f32 %v584_v29 }
 0x37c   :  { %v750_v30 = vpop.eup %749 }
 0x37d   :  { %v586_v31 = vsel %vm579_vm1, %v750_v30, 0.0 }
 0x37e   :  { %587 = vadd.xlane.f32.xlu0 %v586_v31 }
 0x40b   :  { %v588_v32 = vpop.xlane.xlu0 %587 }
 0x40c   :  { %751 = vrcp.f32 %v588_v32 }
 0x416   :  { %v752_v33 = vpop.eup %751 }
 0x417   :  { %v590_v34 = vmul.f32 %v752_v33, %v750_v30 }
 0x419   :  { %591 = vst.msk [vmem:[%s969_s7] sm:$0xff] %vm579_vm1, %v590_v34 }
 0x41a   :  { %596 = vsyncpa [#allocation3], 1 }
 0x41b   :  { %597 = vsyncpa [#allocation5], 1 }
 0x41c   :  { %598 = vsyncpa [#allocation8], 1 }

</bundles_post_ra>
